<compile_context>
chip_gen: v7x
topology: tpu7x:2x2x1
jax: 0.10.0
libtpu: 0.0.40
codegen_flags: <defaults>
</compile_context>

<pallas_src>
import functools
import re

import jax
import jax.numpy as jnp
from jax.experimental import pallas as pl
from jax.experimental.pallas import tpu as pltpu


# ---------------------------------------------------------------------------
# Trace-time helpers (plain Python, run once per wrapper call)
# ---------------------------------------------------------------------------
def _round_up(x, m):
    return (x + m - 1) // m * m


def _divisors(n):
    return [d for d in range(1, n + 1) if n % d == 0]


def _sublane(itemsize):
    # Native second-minor tile rows: f32 -> 8, bf16 -> 16, int8/fp8 -> 32.
    return max(8, 32 // max(1, int(itemsize)))


def _tpu_hardware():
    """Return (vmem_capacity_bytes, generation) with conservative fallbacks."""
    vmem = 128 << 20
    gen = 6
    try:
        vmem = int(pltpu.get_tpu_info().vmem_capacity_bytes)
    except Exception:
        pass
    try:
        kind = jax.devices()[0].device_kind.lower()
        m = re.search(r"v(\d+)", kind)
        if m:
            gen = int(m.group(1))
        elif "7" in kind:
            gen = 7
    except Exception:
        pass
    if gen >= 7:
        vmem = min(vmem, 64 << 20)          # v7x: 64 MiB per TensorCore
    return vmem, gen


def _default_block_cap(vmem_cap):
    # ~8 MiB streaming blocks on 128-MiB-VMEM chips (v5e/v6e), ~3 MiB on v7x.
    return (8 << 20) if vmem_cap >= (96 << 20) else (3 << 20)


def _compiler_params(dim_sem, stream_bytes, vmem_cap):
    # stream_bytes already counts double-buffered streaming I/O blocks; 3x
    # covers in-kernel f32 temporaries plus fixed headroom for small operands.
    want = 3 * stream_bytes + (16 << 20)
    limit = int(min(max(want, 24 << 20), int(0.9 * vmem_cap)))
    return pltpu.CompilerParams(
        dimension_semantics=dim_sem, vmem_limit_bytes=limit)


def _compute_dtype(x_dtype, gen):
    # Keep the big streaming tile in bf16 on chips with a bf16 VPU (v6e/v7x);
    # statistics are always accumulated in f32.
    if x_dtype == jnp.bfloat16 and gen >= 6:
        return jnp.bfloat16
    return jnp.float32


def _pick_fold(T, C, itemsize, max_k=64):
    """Fold factor k (divides T): reshape (T, C) -> (T//k, k*C).

    Prefer k that is simultaneously lane-dense ((k*C) % 128 == 0) and
    sublane-aligned ((T//k) % sublane == 0); otherwise minimize the padded
    (sublane, lane) footprint, breaking ties toward lane-dense stores.
    """
    sub = _sublane(itemsize)
    if C % 128 == 0:
        return 1, sub
    best, best_key = 1, None
    for k in range(1, min(T, max_k) + 1):
        if T % k:
            continue
        Tg, L = T // k, k * C
        padded = _round_up(Tg, sub) * _round_up(L, 128)
        both = (L % 128 == 0) and (Tg % sub == 0)
        lane = (L % 128 == 0)
        key = (not both, padded, not lane, k)
        if best_key is None or key < best_key:
            best, best_key = k, key
    return best, sub


def _pick_batch_block(B, inst_bytes, cap_bytes, min_steps, min_block_bytes=1 << 20):
    """Largest batch block Bb (divides B) fitting cap_bytes, while trying to
    keep >= min_steps grid steps (>= 2 per TensorCore on v7x)."""
    divs = _divisors(B)
    fit = [d for d in divs if d * inst_bytes <= cap_bytes] or [1]
    best = max(fit)
    if B // best < min_steps:
        pref = [d for d in fit
                if B // d >= min_steps and d * inst_bytes >= min_block_bytes]
        if pref:
            best = max(pref)
        elif B >= 2:
            two = [d for d in fit if B // d >= 2]
            if two:
                best = max(two)
    return best


def _pick_chunk(Tg, row_bytes, cap_bytes, sub):
    """Largest T-chunk (divides Tg, sublane aligned) fitting cap_bytes with
    >= 2 chunks; relaxes alignment / chunk-count constraints if needed."""
    divs = _divisors(Tg)
    for align, need_two in ((sub, True), (8, True), (sub, False), (8, False)):
        cand = [d for d in divs
                if d % align == 0 and d * row_bytes <= cap_bytes
                and (Tg // d >= 2 or not need_two)]
        if cand:
            return max(cand)
    aligned = [d for d in divs if d % 8 == 0]
    if aligned:
        return min(aligned)
    # TODO(synk): support ragged (non-divisor) T chunking with a masked tail.
    return Tg


def _plan(B, T, C, itemsize, cap_bytes, min_steps, tile_t_for_steps=False):
    """Choose fold k, batch block Bb and T-chunk Tc for a streaming pass."""
    k, sub = _pick_fold(T, C, itemsize)
    Tg, L = T // k, k * C
    row_bytes = _round_up(L, 128) * itemsize
    inst_bytes = _round_up(Tg, sub) * row_bytes
    if inst_bytes <= cap_bytes:
        Bb = _pick_batch_block(B, inst_bytes, cap_bytes, min_steps)
        Tc = Tg
        if tile_t_for_steps and B // Bb < min_steps:
            Tc = _pick_chunk(Tg, row_bytes, cap_bytes, sub)
    else:
        # One instance exceeds the block budget: chunk the time axis.
        Bb = 1
        Tc = _pick_chunk(Tg, row_bytes, cap_bytes, sub)
    return k, sub, Tg, L, Bb, Tc


# ---------------------------------------------------------------------------
# In-kernel helpers
# ---------------------------------------------------------------------------
def _group_sum(s, k, C):
    """Sum the k lane groups: (Bb, 1, k*C) -> (Bb, 1, C)."""
    acc = s[:, :, 0:C]
    for g in range(1, k):
        acc = acc + s[:, :, g * C:(g + 1) * C]
    return acc


def _fold_lanes(v, k):
    """Broadcast per-feature (Bb, 1, C) to the folded (Bb, 1, k*C) layout."""
    if k == 1:
        return v
    return jnp.concatenate([v] * k, axis=-1)


def _finalize_stats(s1, s2, r, *, k, C, T, eps):
    """Combine shifted partial sums into per-feature mean / stdev.

    For lane group g (a fixed time offset), with d = x - r_g over Tg = T//k
    timesteps:  s1_g = sum d,  s2_g = sum d^2.
      mean = (sum_g s1_g + Tg * sum_g r_g) / T
      var  = (1/T) sum_g [ s2_g + 2*(r_g - mean)*s1_g + Tg*(r_g - mean)^2 ]
    The shift r_g is an actual data value -> no catastrophic cancellation.
    All work here is on (Bb, 1, C)/(Bb, 1, k*C)-sized arrays (tiny).
    """
    Tg = T // k
    inv_T = 1.0 / T
    mean_c = (_group_sum(s1, k, C) + Tg * _group_sum(r, k, C)) * inv_T
    delta = r - _fold_lanes(mean_c, k)
    corr = s2 + 2.0 * delta * s1 + Tg * delta * delta
    var_c = jnp.maximum(_group_sum(corr, k, C) * inv_T, 0.0)
    std_c = jnp.sqrt(var_c + eps)
    return mean_c, std_c


# ---------------------------------------------------------------------------
# Kernels
# ---------------------------------------------------------------------------
def revin_norm_kernel(x_ref, w_ref, b_ref, y_ref, mean_ref, std_ref,
                      *, eps, k, C, T, compute_dtype):
    """Fused stats + normalize for a whole-instance block (Bb, T//k, k*C)."""
    xin = x_ref[...]
    x = xin.astype(jnp.float32)
    r = x[:, 0:1, :]                                  # per-lane-group shift
    d = x - r
    s1 = jnp.sum(d, axis=1, keepdims=True)            # (Bb, 1, k*C)
    s2 = jnp.sum(d * d, axis=1, keepdims=True)
    mean_c, std_c = _finalize_stats(s1, s2, r, k=k, C=C, T=T, eps=eps)

    # Fold affine + inverse-std into a per-feature scale/shift (C lanes only).
    scale_c = w_ref[...] / std_c
    shift_c = b_ref[...] - mean_c * scale_c
    scale_f = _fold_lanes(scale_c, k).astype(compute_dtype)
    shift_f = _fold_lanes(shift_c, k).astype(compute_dtype)

    # Only 1 mul + 1 add on the big tile; no full-tile divide.
    xc = x if compute_dtype == jnp.float32 else xin.astype(compute_dtype)
    y_ref[...] = (xc * scale_f + shift_f).astype(y_ref.dtype)
    mean_ref[...] = mean_c
    std_ref[...] = std_c


def revin_stats_kernel(x_ref, mean_ref, std_ref, s1_ref, s2_ref, r_ref,
                       *, eps, k, C, T):
    """Pass 1 of the T-chunked path: accumulate shifted partial sums."""
    t = pl.program_id(1)
    x = x_ref[...].astype(jnp.float32)                 # (Bb, Tc, k*C)

    @pl.when(t == 0)
    def _init():
        r_ref[...] = x[:, 0:1, :]
        s1_ref[...] = jnp.zeros_like(s1_ref)
        s2_ref[...] = jnp.zeros_like(s2_ref)

    d = x - r_ref[...]
    s1_ref[...] += jnp.sum(d, axis=1, keepdims=True)
    s2_ref[...] += jnp.sum(d * d, axis=1, keepdims=True)

    @pl.when(t == pl.num_programs(1) - 1)
    def _finalize():
        mean_c, std_c = _finalize_stats(s1_ref[...], s2_ref[...], r_ref[...],
                                        k=k, C=C, T=T, eps=eps)
        mean_ref[...] = mean_c
        std_ref[...] = std_c


def revin_apply_kernel(x_ref, mean_ref, std_ref, w_ref, b_ref, y_ref,
                       *, eps, k, denorm, compute_dtype):
    """Streaming y = x*scale + shift over (batch, T-chunk) tiles."""
    mean = mean_ref[...]                               # (Bb, 1, C) f32
    std = std_ref[...]
    w = w_ref[...]                                     # (1, 1, C) f32
    b = b_ref[...]
    if denorm:
        # y = (x - b)/(w + eps^2) * std + mean
        scale_c = std / (w + eps * eps)
        shift_c = mean - b * scale_c
    else:
        # y = (x - mean)/std * w + b
        scale_c = w / std
        shift_c = b - mean * scale_c
    scale_f = _fold_lanes(scale_c, k).astype(compute_dtype)
    shift_f = _fold_lanes(shift_c, k).astype(compute_dtype)
    x = x_ref[...].astype(compute_dtype)
    y_ref[...] = (x * scale_f + shift_f).astype(y_ref.dtype)


# ---------------------------------------------------------------------------
# Wrappers
# ---------------------------------------------------------------------------
def _apply_call(xf, mean3, std3, w3, b3, *, eps, denorm, plan, x_dtype,
                vmem_cap, gen):
    k, sub, Tg, L, Bb, Tc = plan
    B = xf.shape[0]
    C = mean3.shape[-1]
    itemsize = jnp.dtype(x_dtype).itemsize
    block_bytes = Bb * _round_up(Tc, sub) * _round_up(L, 128) * itemsize
    compute_dtype = _compute_dtype(x_dtype, gen)
    kernel = functools.partial(revin_apply_kernel, eps=eps, k=k,
                               denorm=denorm, compute_dtype=compute_dtype)
    return pl.pallas_call(
        kernel,
        out_shape=jax.ShapeDtypeStruct((B, Tg, L), x_dtype),
        grid_spec=pltpu.PrefetchScalarGridSpec(
            num_scalar_prefetch=0,
            grid=(B // Bb, Tg // Tc),
            in_specs=[
                pl.BlockSpec((Bb, Tc, L), lambda i, t: (i, t, 0)),   # x
                pl.BlockSpec((Bb, 1, C), lambda i, t: (i, 0, 0)),    # mean
                pl.BlockSpec((Bb, 1, C), lambda i, t: (i, 0, 0)),    # stdev
                pl.BlockSpec((1, 1, C), lambda i, t: (0, 0, 0)),     # weight
                pl.BlockSpec((1, 1, C), lambda i, t: (0, 0, 0)),     # bias
            ],
            out_specs=pl.BlockSpec((Bb, Tc, L), lambda i, t: (i, t, 0)),
        ),
        compiler_params=_compiler_params(("parallel", "parallel"),
                                         4 * block_bytes, vmem_cap),
    )(xf, mean3, std3, w3, b3)


def revin_norm(x, weight, bias, *, eps=1e-5, block_cap_bytes=None):
    """x: (B, T, C). Returns (y, mean, stdev); mean/stdev are (B, 1, C) f32."""
    B, T, C = x.shape
    vmem_cap, gen = _tpu_hardware()
    cap = block_cap_bytes if block_cap_bytes is not None else _default_block_cap(vmem_cap)
    min_steps = 4 if gen >= 7 else 2                  # >= 2 per TC on v7x
    itemsize = jnp.dtype(x.dtype).itemsize
    plan = _plan(B, T, C, itemsize, cap, min_steps)
    k, sub, Tg, L, Bb, Tc = plan

    xf = x.reshape(B, Tg, L)                          # contiguous, metadata-only
    w3 = weight.reshape(1, 1, C).astype(jnp.float32)
    b3 = bias.reshape(1, 1, C).astype(jnp.float32)

    if Tc == Tg:
        # Whole time axis fits the block budget: fused single pass over x.
        compute_dtype = _compute_dtype(x.dtype, gen)
        kernel = functools.partial(revin_norm_kernel, eps=eps, k=k, C=C, T=T,
                                   compute_dtype=compute_dtype)
        inst_block = _round_up(Tg, sub) * _round_up(L, 128) * itemsize
        y, mean, std = pl.pallas_call(
            kernel,
            out_shape=(jax.ShapeDtypeStruct((B, Tg, L), x.dtype),
                       jax.ShapeDtypeStruct((B, 1, C), jnp.float32),
                       jax.ShapeDtypeStruct((B, 1, C), jnp.float32)),
            grid_spec=pltpu.PrefetchScalarGridSpec(
                num_scalar_prefetch=0,
                grid=(B // Bb,),
                in_specs=[pl.BlockSpec((Bb, Tg, L), lambda i: (i, 0, 0)),
                          pl.BlockSpec((1, 1, C), lambda i: (0, 0, 0)),
                          pl.BlockSpec((1, 1, C), lambda i: (0, 0, 0))],
                out_specs=[pl.BlockSpec((Bb, Tg, L), lambda i: (i, 0, 0)),
                           pl.BlockSpec((Bb, 1, C), lambda i: (i, 0, 0)),
                           pl.BlockSpec((Bb, 1, C), lambda i: (i, 0, 0))],
            ),
            compiler_params=_compiler_params(("parallel",),
                                             4 * Bb * inst_block, vmem_cap),
        )(xf, w3, b3)
        return y.reshape(B, T, C), mean, std

    # One instance exceeds the block budget: pass 1 accumulates shifted
    # partial sums over T chunks (reduction axis -> "arbitrary"), pass 2
    # streams x again to apply the per-feature scale/shift.
    chunk_block = Bb * _round_up(Tc, sub) * _round_up(L, 128) * itemsize
    stats_kernel = functools.partial(revin_stats_kernel, eps=eps, k=k, C=C, T=T)
    mean, std = pl.pallas_call(
        stats_kernel,
        out_shape=(jax.ShapeDtypeStruct((B, 1, C), jnp.float32),
                   jax.ShapeDtypeStruct((B, 1, C), jnp.float32)),
        grid_spec=pltpu.PrefetchScalarGridSpec(
            num_scalar_prefetch=0,
            grid=(B // Bb, Tg // Tc),
            in_specs=[pl.BlockSpec((Bb, Tc, L), lambda i, t: (i, t, 0))],
            out_specs=[pl.BlockSpec((Bb, 1, C), lambda i, t: (i, 0, 0)),
                       pl.BlockSpec((Bb, 1, C), lambda i, t: (i, 0, 0))],
            scratch_shapes=[pltpu.VMEM((Bb, 1, L), jnp.float32),   # s1
                            pltpu.VMEM((Bb, 1, L), jnp.float32),   # s2
                            pltpu.VMEM((Bb, 1, L), jnp.float32)],  # shift r
        ),
        compiler_params=_compiler_params(("parallel", "arbitrary"),
                                         2 * chunk_block, vmem_cap),
    )(xf)
    y = _apply_call(xf, mean, std, w3, b3, eps=eps, denorm=False, plan=plan,
                    x_dtype=x.dtype, vmem_cap=vmem_cap, gen=gen)
    return y.reshape(B, T, C), mean, std


def revin_denorm(x, mean, std, weight, bias, *, eps=1e-5, block_cap_bytes=None):
    """x: (B, T, C); mean/std: (B, 1, C). Returns the denormalized series."""
    B, T, C = x.shape
    vmem_cap, gen = _tpu_hardware()
    cap = block_cap_bytes if block_cap_bytes is not None else _default_block_cap(vmem_cap)
    min_steps = 4 if gen >= 7 else 2
    itemsize = jnp.dtype(x.dtype).itemsize
    # Denorm has no reduction over T -> always free to tile the time axis.
    plan = _plan(B, T, C, itemsize, cap, min_steps, tile_t_for_steps=True)
    k, sub, Tg, L, Bb, Tc = plan

    xf = x.reshape(B, Tg, L)
    w3 = weight.reshape(1, 1, C).astype(jnp.float32)
    b3 = bias.reshape(1, 1, C).astype(jnp.float32)
    mean3 = mean.reshape(B, 1, C).astype(jnp.float32)
    std3 = std.reshape(B, 1, C).astype(jnp.float32)
    y = _apply_call(xf, mean3, std3, w3, b3, eps=eps, denorm=True, plan=plan,
                    x_dtype=x.dtype, vmem_cap=vmem_cap, gen=gen)
    return y.reshape(B, T, C)


# ---------------------------------------------------------------------------
# Pure-JAX references (mirror the PyTorch module)
# ---------------------------------------------------------------------------
def revin_ref_norm(x, weight, bias, eps=1e-5):
    x = x.astype(jnp.float32)
    mean = jnp.mean(x, axis=1, keepdims=True)
    std = jnp.sqrt(jnp.var(x, axis=1, keepdims=True) + eps)
    y = (x - mean) / std
    y = y * weight.reshape(1, 1, -1) + bias.reshape(1, 1, -1)
    return y, mean, std


def revin_ref_denorm(x, mean, std, weight, bias, eps=1e-5):
    x = x.astype(jnp.float32)
    y = x - bias.reshape(1, 1, -1)
    y = y / (weight.reshape(1, 1, -1) + eps * eps)
    y = y * std + mean
    return y


# ---------------------------------------------------------------------------
if __name__ == "__main__":
    eps = 1e-5
    key = jax.random.PRNGKey(0)

    # ---- Case 1: small demo shape, fused whole-T path ----------------------
    B, T, C = 2, 8, 32
    k1, k2 = jax.random.split(key)
    x = jax.random.normal(k1, (B, T, C), dtype=jnp.float32) * 3.0 + 1.5
    w = jnp.ones((C,), jnp.float32)            # RevIN._init_params defaults
    b = jnp.zeros((C,), jnp.float32)

    y, mean, std = revin_norm(x, w, b, eps=eps)
    y = jax.block_until_ready(y)
    x_rec = jax.block_until_ready(revin_denorm(y, mean, std, w, b, eps=eps))

    y_ref, mean_ref, std_ref = revin_ref_norm(x, w, b, eps)
    x_rec_ref = revin_ref_denorm(y_ref, mean_ref, std_ref, w, b, eps)
    assert jnp.allclose(y, y_ref, atol=1e-5, rtol=1e-5)
    assert jnp.allclose(mean, mean_ref, atol=1e-5, rtol=1e-5)
    assert jnp.allclose(std, std_ref, atol=1e-5, rtol=1e-5)
    assert jnp.allclose(x_rec, x_rec_ref, atol=1e-5, rtol=1e-5)
    assert jnp.allclose(x_rec, x, atol=1e-3, rtol=1e-3)   # round trip

    # ---- Case 2: forced T-chunked path (stats accumulation + apply) --------
    B, T, C = 2, 64, 32
    k1, k2 = jax.random.split(k2)
    x = jax.random.normal(k1, (B, T, C), dtype=jnp.float32) * 2.0 + 5.0
    w = 1.0 + 0.1 * jnp.arange(C, dtype=jnp.float32) / C
    b = 0.05 * jnp.arange(C, dtype=jnp.float32)
    cap = 4096                                  # force the chunked 2-pass path
    y, mean, std = revin_norm(x, w, b, eps=eps, block_cap_bytes=cap)
    x_rec = revin_denorm(y, mean, std, w, b, eps=eps, block_cap_bytes=cap)
    x_rec = jax.block_until_ready(x_rec)
    y_ref, mean_ref, std_ref = revin_ref_norm(x, w, b, eps)
    x_rec_ref = revin_ref_denorm(y_ref, mean_ref, std_ref, w, b, eps)
    assert jnp.allclose(y, y_ref, atol=1e-5, rtol=1e-5)
    assert jnp.allclose(mean, mean_ref, atol=1e-5, rtol=1e-5)
    assert jnp.allclose(std, std_ref, atol=1e-5, rtol=1e-5)
    assert jnp.allclose(x_rec, x_rec_ref, atol=1e-4, rtol=1e-4)

    # ---- Case 3: bf16 I/O (big-tile math stays bf16 on v6e/v7x) ------------
    B, T, C = 4, 32, 32
    xb = (jax.random.normal(k2, (B, T, C), dtype=jnp.float32) * 3.0 + 1.5
          ).astype(jnp.bfloat16)
    w = jnp.ones((C,), jnp.float32)
    b = jnp.zeros((C,), jnp.float32)
    yb, mb, sb = revin_norm(xb, w, b, eps=eps)
    yb = jax.block_until_ready(yb)
    yb_ref, mb_ref, sb_ref = revin_ref_norm(xb.astype(jnp.float32), w, b, eps)
    assert jnp.allclose(mb, mb_ref, atol=1e-4, rtol=1e-4)
    assert jnp.allclose(sb, sb_ref, atol=1e-4, rtol=1e-4)
    assert jnp.allclose(yb.astype(jnp.float32), yb_ref, atol=6e-2, rtol=6e-2)

    print("KERNEL_OK")
</pallas_src>

<mosaic_0001>
module attributes {stable_mosaic.version = 11 : i64} {
  func.func @revin_norm_kernel(%arg0: i32, %arg1: memref<1x2x128xf32, #tpu.memory_space<vmem>>, %arg2: memref<1x1x32xf32, #tpu.memory_space<vmem>>, %arg3: memref<1x1x32xf32, #tpu.memory_space<vmem>>, %arg4: memref<1x2x128xf32, #tpu.memory_space<vmem>>, %arg5: memref<1x1x32xf32, #tpu.memory_space<vmem>>, %arg6: memref<1x1x32xf32, #tpu.memory_space<vmem>>) attributes {dimension_semantics = [#tpu.dimension_semantics<parallel>], iteration_bounds = array<i64: 2>, scalar_prefetch = 0 : i64, scratch_operands = 0 : i64, tpu.core_type = #tpu.core_type<tc>, window_params = [{transform_indices = @transform_0, window_bounds = array<i64: 1, 2, 128>}, {pipeline_mode = #tpu.pipeline_mode<synchronous>, transform_indices = @transform_1, window_bounds = array<i64: 1, 1, 32>}, {pipeline_mode = #tpu.pipeline_mode<synchronous>, transform_indices = @transform_2, window_bounds = array<i64: 1, 1, 32>}, {transform_indices = @transform_3, window_bounds = array<i64: 1, 2, 128>}, {transform_indices = @transform_4, window_bounds = array<i64: 1, 1, 32>}, {transform_indices = @transform_5, window_bounds = array<i64: 1, 1, 32>}]} {
    %c0 = arith.constant 0 : index
    %c0_0 = arith.constant 0 : index
    %c0_1 = arith.constant 0 : index
    %0 = vector.load %arg1[%c0, %c0_0, %c0_1] : memref<1x2x128xf32, #tpu.memory_space<vmem>>, vector<1x2x128xf32>
    %1 = vector.extract_strided_slice %0 {offsets = [0, 0, 0], sizes = [1, 1, 128], strides = [1, 1, 1]} : vector<1x2x128xf32> to vector<1x1x128xf32>
    %2 = vector.broadcast %1 : vector<1x1x128xf32> to vector<1x2x128xf32>
    %3 = arith.subf %0, %2 : vector<1x2x128xf32>
    %cst = arith.constant dense<0.000000e+00> : vector<1x128xf32>
    %4 = vector.multi_reduction <add>, %3, %cst [1] : vector<1x2x128xf32> to vector<1x128xf32>
    %5 = vector.shape_cast %4 : vector<1x128xf32> to vector<1x1x128xf32>
    %6 = arith.mulf %3, %3 : vector<1x2x128xf32>
    %cst_2 = arith.constant dense<0.000000e+00> : vector<1x128xf32>
    %7 = vector.multi_reduction <add>, %6, %cst_2 [1] : vector<1x2x128xf32> to vector<1x128xf32>
    %8 = vector.shape_cast %7 : vector<1x128xf32> to vector<1x1x128xf32>
    %9 = vector.extract_strided_slice %5 {offsets = [0, 0, 0], sizes = [1, 1, 32], strides = [1, 1, 1]} : vector<1x1x128xf32> to vector<1x1x32xf32>
    %10 = vector.extract_strided_slice %5 {offsets = [0, 0, 32], sizes = [1, 1, 32], strides = [1, 1, 1]} : vector<1x1x128xf32> to vector<1x1x32xf32>
    %11 = arith.addf %9, %10 : vector<1x1x32xf32>
    %12 = vector.extract_strided_slice %5 {offsets = [0, 0, 64], sizes = [1, 1, 32], strides = [1, 1, 1]} : vector<1x1x128xf32> to vector<1x1x32xf32>
    %13 = arith.addf %11, %12 : vector<1x1x32xf32>
    %14 = vector.extract_strided_slice %5 {offsets = [0, 0, 96], sizes = [1, 1, 32], strides = [1, 1, 1]} : vector<1x1x128xf32> to vector<1x1x32xf32>
    %15 = arith.addf %13, %14 : vector<1x1x32xf32>
    %16 = vector.extract_strided_slice %1 {offsets = [0, 0, 0], sizes = [1, 1, 32], strides = [1, 1, 1]} : vector<1x1x128xf32> to vector<1x1x32xf32>
    %17 = vector.extract_strided_slice %1 {offsets = [0, 0, 32], sizes = [1, 1, 32], strides = [1, 1, 1]} : vector<1x1x128xf32> to vector<1x1x32xf32>
    %18 = arith.addf %16, %17 : vector<1x1x32xf32>
    %19 = vector.extract_strided_slice %1 {offsets = [0, 0, 64], sizes = [1, 1, 32], strides = [1, 1, 1]} : vector<1x1x128xf32> to vector<1x1x32xf32>
    %20 = arith.addf %18, %19 : vector<1x1x32xf32>
    %21 = vector.extract_strided_slice %1 {offsets = [0, 0, 96], sizes = [1, 1, 32], strides = [1, 1, 1]} : vector<1x1x128xf32> to vector<1x1x32xf32>
    %22 = arith.addf %20, %21 : vector<1x1x32xf32>
    %cst_3 = arith.constant 2.000000e+00 : f32
    %23 = vector.broadcast %cst_3 : f32 to vector<1x1x32xf32>
    %24 = arith.mulf %23, %22 : vector<1x1x32xf32>
    %25 = arith.addf %15, %24 : vector<1x1x32xf32>
    %cst_4 = arith.constant 1.250000e-01 : f32
    %26 = vector.broadcast %cst_4 : f32 to vector<1x1x32xf32>
    %27 = arith.mulf %25, %26 : vector<1x1x32xf32>
    %28 = tpu.concatenate %27, %27, %27, %27 in 2 : vector<1x1x32xf32>, vector<1x1x32xf32>, vector<1x1x32xf32>, vector<1x1x32xf32> -> vector<1x1x128xf32>
    %29 = arith.subf %1, %28 : vector<1x1x128xf32>
    %cst_5 = arith.constant 2.000000e+00 : f32
    %30 = vector.broadcast %cst_5 : f32 to vector<1x1x128xf32>
    %31 = arith.mulf %30, %29 : vector<1x1x128xf32>
    %32 = arith.mulf %31, %5 : vector<1x1x128xf32>
    %33 = arith.addf %8, %32 : vector<1x1x128xf32>
    %cst_6 = arith.constant 2.000000e+00 : f32
    %34 = vector.broadcast %cst_6 : f32 to vector<1x1x128xf32>
    %35 = arith.mulf %34, %29 : vector<1x1x128xf32>
    %36 = arith.mulf %35, %29 : vector<1x1x128xf32>
    %37 = arith.addf %33, %36 : vector<1x1x128xf32>
    %38 = vector.extract_strided_slice %37 {offsets = [0, 0, 0], sizes = [1, 1, 32], strides = [1, 1, 1]} : vector<1x1x128xf32> to vector<1x1x32xf32>
    %39 = vector.extract_strided_slice %37 {offsets = [0, 0, 32], sizes = [1, 1, 32], strides = [1, 1, 1]} : vector<1x1x128xf32> to vector<1x1x32xf32>
    %40 = arith.addf %38, %39 : vector<1x1x32xf32>
    %41 = vector.extract_strided_slice %37 {offsets = [0, 0, 64], sizes = [1, 1, 32], strides = [1, 1, 1]} : vector<1x1x128xf32> to vector<1x1x32xf32>
    %42 = arith.addf %40, %41 : vector<1x1x32xf32>
    %43 = vector.extract_strided_slice %37 {offsets = [0, 0, 96], sizes = [1, 1, 32], strides = [1, 1, 1]} : vector<1x1x128xf32> to vector<1x1x32xf32>
    %44 = arith.addf %42, %43 : vector<1x1x32xf32>
    %cst_7 = arith.constant 1.250000e-01 : f32
    %45 = vector.broadcast %cst_7 : f32 to vector<1x1x32xf32>
    %46 = arith.mulf %44, %45 : vector<1x1x32xf32>
    %cst_8 = arith.constant 0.000000e+00 : f32
    %47 = vector.broadcast %cst_8 : f32 to vector<1x1x32xf32>
    %48 = arith.maximumf %46, %47 : vector<1x1x32xf32>
    %cst_9 = arith.constant 9.99999974E-6 : f32
    %49 = vector.broadcast %cst_9 : f32 to vector<1x1x32xf32>
    %50 = arith.addf %48, %49 : vector<1x1x32xf32>
    %51 = math.sqrt %50 : vector<1x1x32xf32>
    %c0_10 = arith.constant 0 : index
    %c0_11 = arith.constant 0 : index
    %c0_12 = arith.constant 0 : index
    %52 = vector.load %arg2[%c0_10, %c0_11, %c0_12] : memref<1x1x32xf32, #tpu.memory_space<vmem>>, vector<1x1x32xf32>
    %53 = arith.divf %52, %51 : vector<1x1x32xf32>
    %c0_13 = arith.constant 0 : index
    %c0_14 = arith.constant 0 : index
    %c0_15 = arith.constant 0 : index
    %54 = vector.load %arg3[%c0_13, %c0_14, %c0_15] : memref<1x1x32xf32, #tpu.memory_space<vmem>>, vector<1x1x32xf32>
    %55 = arith.mulf %27, %53 : vector<1x1x32xf32>
    %56 = arith.subf %54, %55 : vector<1x1x32xf32>
    %57 = tpu.concatenate %53, %53, %53, %53 in 2 : vector<1x1x32xf32>, vector<1x1x32xf32>, vector<1x1x32xf32>, vector<1x1x32xf32> -> vector<1x1x128xf32>
    %58 = tpu.concatenate %56, %56, %56, %56 in 2 : vector<1x1x32xf32>, vector<1x1x32xf32>, vector<1x1x32xf32>, vector<1x1x32xf32> -> vector<1x1x128xf32>
    %59 = vector.broadcast %57 : vector<1x1x128xf32> to vector<1x2x128xf32>
    %60 = arith.mulf %0, %59 : vector<1x2x128xf32>
    %61 = vector.broadcast %58 : vector<1x1x128xf32> to vector<1x2x128xf32>
    %62 = arith.addf %60, %61 : vector<1x2x128xf32>
    %c0_16 = arith.constant 0 : index
    %c0_17 = arith.constant 0 : index
    %c0_18 = arith.constant 0 : index
    %63 = vector.load %arg4[%c0_16, %c0_17, %c0_18] : memref<1x2x128xf32, #tpu.memory_space<vmem>>, vector<1x2x128xf32>
    tpu.vector_store %arg4[%c0_16, %c0_17, %c0_18], %62 {strides = array<i32>} : memref<1x2x128xf32, #tpu.memory_space<vmem>>, vector<1x2x128xf32>,
    %c0_19 = arith.constant 0 : index
    %c0_20 = arith.constant 0 : index
    %c0_21 = arith.constant 0 : index
    %64 = vector.load %arg5[%c0_19, %c0_20, %c0_21] : memref<1x1x32xf32, #tpu.memory_space<vmem>>, vector<1x1x32xf32>
    tpu.vector_store %arg5[%c0_19, %c0_20, %c0_21], %27 {strides = array<i32>} : memref<1x1x32xf32, #tpu.memory_space<vmem>>, vector<1x1x32xf32>,
    %c0_22 = arith.constant 0 : index
    %c0_23 = arith.constant 0 : index
    %c0_24 = arith.constant 0 : index
    %65 = vector.load %arg6[%c0_22, %c0_23, %c0_24] : memref<1x1x32xf32, #tpu.memory_space<vmem>>, vector<1x1x32xf32>
    tpu.vector_store %arg6[%c0_22, %c0_23, %c0_24], %51 {strides = array<i32>} : memref<1x1x32xf32, #tpu.memory_space<vmem>>, vector<1x1x32xf32>,
    return
  }
  func.func @transform_0(%arg0: i32) -> (i32, i32, i32) {
    %c0_i32 = arith.constant 0 : i32
    %c0_i32_0 = arith.constant 0 : i32
    %c0_i32_1 = arith.constant 0 : i32
    return %arg0, %c0_i32, %c0_i32_0 : i32, i32, i32
  }
  func.func @transform_1(%arg0: i32) -> (i32, i32, i32) {
    %c0_i32 = arith.constant 0 : i32
    %c0_i32_0 = arith.constant 0 : i32
    %c0_i32_1 = arith.constant 0 : i32
    %c0_i32_2 = arith.constant 0 : i32
    return %c0_i32, %c0_i32_0, %c0_i32_1 : i32, i32, i32
  }
  func.func @transform_2(%arg0: i32) -> (i32, i32, i32) {
    %c0_i32 = arith.constant 0 : i32
    %c0_i32_0 = arith.constant 0 : i32
    %c0_i32_1 = arith.constant 0 : i32
    %c0_i32_2 = arith.constant 0 : i32
    return %c0_i32, %c0_i32_0, %c0_i32_1 : i32, i32, i32
  }
  func.func @transform_3(%arg0: i32) -> (i32, i32, i32) {
    %c0_i32 = arith.constant 0 : i32
    %c0_i32_0 = arith.constant 0 : i32
    %c0_i32_1 = arith.constant 0 : i32
    return %arg0, %c0_i32, %c0_i32_0 : i32, i32, i32
  }
  func.func @transform_4(%arg0: i32) -> (i32, i32, i32) {
    %c0_i32 = arith.constant 0 : i32
    %c0_i32_0 = arith.constant 0 : i32
    %c0_i32_1 = arith.constant 0 : i32
    return %arg0, %c0_i32, %c0_i32_0 : i32, i32, i32
  }
  func.func @transform_5(%arg0: i32) -> (i32, i32, i32) {
    %c0_i32 = arith.constant 0 : i32
    %c0_i32_0 = arith.constant 0 : i32
    %c0_i32_1 = arith.constant 0 : i32
    return %arg0, %c0_i32, %c0_i32_0 : i32, i32, i32
  }
}

</mosaic_0001>

<bundles_post_ra>
// kernel: tpu_custom_call.1
= control target key start
LH: loop header
LB: loop body
LE: loop exit
PB: predicated region body
PF: predicated region fallthrough
CT: control target
= control target key end

     0   :  { %11 = vsyncpa [#allocation3], 0  ;;  %s1151_s0 = inlined_call_operand.hbm [shape: f32[2,2,128], index: 0, kind: input, shape index: {}]   ;;  %s1152_s1 = inlined_call_operand.vmem [shape: f32[1,1,32], index: 1, kind: input, shape index: {}]   ;;  %s1153_s2 = inlined_call_operand.vmem [shape: f32[1,1,32], index: 2, kind: input, shape index: {}]   ;;  %s1154_s3 = inlined_call_operand.hbm [shape: f32[2,2,128], index: 3, kind: output, shape index: {0}]   ;;  %s1155_s4 = inlined_call_operand.hbm [shape: f32[2,1,32], index: 4, kind: output, shape index: {1}]   ;;  %s1156_s5 = inlined_call_operand.hbm [shape: f32[2,1,32], index: 5, kind: output, shape index: {2}]  }
   0x1   :  { %13 = vsyncpa [#allocation3 + $0x1], 0 }
   0x2   :  { %14 = vsyncpa [#allocation4], 0 }
   0x3   :  { %16 = vsyncpa [#allocation4 + $0x1], 0 }
   0x4   :  { %17 = vsyncpa [#allocation7], 0 }
   0x5   :  { %19 = vsyncpa [#allocation7 + $0x1], 0  ;;  %s849_s18 = smov 0   ;;  %s851_s19 = smov 0  }
   0x6   :  { %s853_s20 = smov 0   ;;  %s855_s21 = smov 0  }
   0x7 LB: > { %s870_s22 = sadd.s32 4294967295, %s810_s21   ;;  %s1158_s23 = sadd.s32 4294967294, %s810_s21   ;;  %s810_s21 = sphi %s855_s21, %s1177_s21   ;;  %s806_s20 = sphi %s853_s20, %s1176_s20   ;;  %s802_s19 = sphi %s851_s19, %s1175_s19   ;;  %s798_s18 = sphi %s849_s18, %s1174_s18  }
   0x8   : > { %s874_s24 = sadd.s32 1, %s810_s21   ;;  %s32_s25 = sadd.s32 1, %s806_s20 }
   0x9   : > { %s29_s26 = ssub.s32 %s810_s21, %s874_s24  ;;  %p39_p0 = scmp.ne.s32.totalorder %s806_s20, %s802_s19 }
   0xa   : > { %p30_p1 = scmp.eq.s32.totalorder %s29_s26, 0  ;;  %p40_p2 = scmp.eq.s32.totalorder %s810_s21, 0 }
   0xb   : > { %p45_p3 = scmp.ne.s32.totalorder %s802_s19, %s798_s18  ;;  %p46_p4 = scmp.eq.s32.totalorder %s870_s22, 0 }
   0xc   : > { %s886_s27 = scalar_select %p30_p1, %s806_s20, %s32_s25  }
   0xd   : > { %p888_p5 = por %p40_p2, %p39_p0  ;;  %p892_p6 = por %p46_p4, %p45_p3 }
   0xe   : > { %p111_p7 = scmp.eq.s32.totalorder %s870_s22, 1  ;;  %p117_p8 = scmp.eq.s32.totalorder %s1158_s23, 1 }
   0xf   : > { %p613_p10 = scmp.lt.s32.totalorder %s810_s21, 2  ;;  %s195_s7 = sand.u32 1, %s806_s20  }
  0x10   : > { %p901_p11 = por %p111_p7, %p39_p0  ;;  %p905_p12 = por %p117_p8, %p45_p3 }
  0x11   : > { %s581_s8 = sshll.u32 %s810_s21, 5  ;;  %s580_s9 = sshll.u32 %s195_s7, 1 }
  0x12   : > { %s1163_s30 = scalar_select %p901_p11, 1, 0 }
  0x13   : > { %s1164_s6 = scalar_select %p905_p12, 1, 0 }
  0x14   : > { %s914_s12 = scalar_lea.hbm %s1151_s0, %s581_s8  ;;  %s199_s13 = scalar_lea.vmem [#allocation2], %s580_s9 }
  0x15   : > { %s206_s14 = sshll.u32 %s199_s13, 4  ;;  %p918_p13 = pnand %p613_p10, %p888_p5  ;;  %s922_s14 = int_to_ptr.vmem [resolvable:$true] %s206_s14 }
  0x16   : > { %s196_s16 = scalar_lea.sflag [#allocation3], %s195_s7  ;;  %s654_s17 = scalar_lea.hbm %s914_s12, 32 }
  0x17   : > { %p655_p2 = scmp.ne.s32.totalorder %s914_s12, %s654_s17  ;;  %p656_p3 = pneg %p918_p13 }
  0x18   : > { %s659_s28 = scalar_lea.hbm %s1151_s0, 64  ;;  %p660_p5 = scmp.lt.u32.totalorder %s914_s12, %s1151_s0 }
  0x19   : > { %p657_p4 = pnand %p656_p3, %p655_p2  ;;  %p661_p8 = scmp.lt.u32.totalorder %s659_s28, %s654_s17 }
  0x1a   : > { %p663_p9 = scmp.lt.u32.totalorder %s654_s17, %s914_s12 }
  0x1b   : > { %p658_p7 = pneg %p657_p4  ;;  %p662_p10 = por %p661_p8, %p660_p5 }
  0x1d   : > { %p664_p0 = por %p663_p9, %p662_p10 }
  0x1f   : > { %p665_p1 = pnand %p664_p0, %p658_p7 }
  0x21   : > { %668 = shalt.err (!%p665_p1)
}
  0x22   : > { %s669_s7 = scalar_lea.vmem %s922_s14, 32  ;;  %s812_s10 = smov [#allocation2]  }
  0x23   : > { %p670_p2 = scmp.ne.s32.totalorder %s922_s14, %s669_s7  ;;  %s674_s11 = sshll.u32 %s812_s10, 4  ;;  %s675_s11 = int_to_ptr.vmem [resolvable:$false] %s674_s11 }
  0x24   : > { %s676_s13 = scalar_lea.vmem %s675_s11, 64  ;;  %p677_p11 = scmp.lt.s32.totalorder %s922_s14, %s675_s11 }
  0x25   : > { %p672_p4 = pnand %p670_p2, %p656_p3  ;;  %p678_p5 = scmp.lt.s32.totalorder %s676_s13, %s669_s7 }
  0x27   : > { %p673_p12 = pneg %p672_p4  ;;  %p679_p8 = por %p678_p5, %p677_p11 }
  0x29   : > { %p680_p9 = pnand %p679_p8, %p673_p12 }
  0x2b   : > { %683 = shalt.err (!%p680_p9)
}
  0x2c   : > { %602 = dma.hbm_to_vmem [thread:$0]  (!%p918_p13), %s914_s12, 32, %s922_s14, %s196_s16  }
  0x2d   : > { %p1166_p0 = scmp.lt.s32.totalorder %s810_s21, 3  ;;  %p1167_p1 = scmp.ge.s32.totalorder %s810_s21, 1 }
  0x2f   : > { %p212_p3 = pnand %p1167_p1, %p1166_p0 }
  0x30   : > { %s956_s17 = sand.u32 (!%p212_p3), 1, %s802_s19  }
  0x31   : > { %215 = sbr.rel (%p212_p3) target bundleno = 652 (0x28c), region = 32  ;;  %s1159_s25 = sshll.u32 (!%p212_p3), %s956_s17, 1 }
  0x32   : > { %s218_s26 = scalar_lea.sflag (!%p212_p3), [#allocation3], %s956_s17  ;;  %s221_s15 = scalar_lea.vmem (!%p212_p3), [#allocation2], %s1159_s25 }
  0x38   : > { %785 = dma.done.wait (%p892_p6), %s218_s26, 32  }
  0x39   : > { %787 = vsyncadd (%p892_p6), %s218_s26, 4294967264  ;;  %v257_v0 = vlaneseq  ;;  %v968_v3 = vld [vmem:[%s221_s15] sm:$0x3]  ;;  %s1160_s12 = smov 64   ;;  %s814_s14 = smov 96   ;;  %vm262_vm0 = vcmask 1041408  }
  0x3a   : > { %296 = vrot.lane.b32.xlu1 %v968_v3, %s1160_s12  ;;  %292 = vrot.lane.b32.xlu0 %v968_v3, %s814_s14  ;;  %s815_s29 = smov 32   ;;  %vm403_vm1 = vcmask 253952   ;;  %s249_s16 = scalar_lea.vmem [#allocation6], %s956_s17  ;;  %vm317_vm2 = vcmask 261120   ;;  %vm319_vm3 = vcmask 523264   ;;  %vm321_vm4 = vcmask 785408  }
  0x3b   : > { %v258_v1 = vshrl.u32 %v257_v0, 7  ;;  %s255_s28 = scalar_lea.vmem [#allocation8], %s956_s17  ;;  %v352_v62 = vld [vmem:[%s1152_s1] sm:$0x1]  ;;  %s411_s11 = sand.u32 1, %s870_s22  }
  0x3c   : > { %s587_s13 = sshll.u32 %s870_s22, 4  ;;  %s441_s9 = sshll.u32 %s249_s16, 4  ;;  %s442_s9 = int_to_ptr.vmem [resolvable:$true] %s441_s9 }
  0x3d   : > { %v966_v2 = vsub.s32 0, %v258_v1  ;;  %v355_v1 = vld [vmem:[%s1153_s2] sm:$0x1]  ;;  %s1025_s8 = scalar_lea.hbm %s1155_s4, %s587_s13  ;;  %s1031_s7 = scalar_lea.sflag [#allocation7], %s411_s11 }
  0x3e   : > { %s684_s10 = scalar_lea.vmem %s442_s9, 16  ;;  %p1168_p11 = scmp.ne.s32.totalorder %s1163_s30, 0 }
  0x3f   : > { %v260_v4 = vrot.slane %v968_v3, %v966_v2  ;;  %p685_p6 = scmp.ne.s32.totalorder %s442_s9, %s684_s10  ;;  %s816_s23 = smov [#allocation6]  }
  0x40   : > { %s688_s25 = sshll.u32 %s816_s23, 4  ;;  %s689_s25 = int_to_ptr.vmem [resolvable:$false] %s688_s25 }
  0x41   : > { %v261_v5 = vsub.f32 %v968_v3, %v260_v4  ;;  %p686_p12 = pnand %p685_p6, %p1168_p11  ;;  %p691_p7 = scmp.lt.s32.totalorder %s442_s9, %s689_s25 }
  0x43   : > { %v263_v6 = vsel %vm262_vm0, %v261_v5, 0.0  ;;  %v270_v28 = vmul.f32 %v261_v5, %v261_v5  ;;  %p687_p13 = pneg %p686_p12 }
  0x44   : > { %v264_v7 = vrot.slane %v263_v6, 4 }
  0x45   : > { %v271_v29 = vsel %vm262_vm0, %v270_v28, 0.0 }
  0x46   : > { %v265_v8 = vadd.f32 %v264_v7, %v263_v6  ;;  %v272_v30 = vrot.slane %v271_v29, 4 }
  0x48   : > { %v266_v9 = vrot.slane %v265_v8, 2  ;;  %v273_v31 = vadd.f32 %v272_v30, %v271_v29 }
  0x4a   : > { %v267_v10 = vadd.f32 %v266_v9, %v265_v8  ;;  %v274_v32 = vrot.slane %v273_v31, 2 }
  0x4c   : > { %v268_v11 = vrot.slane %v267_v10, 1  ;;  %v275_v34 = vadd.f32 %v274_v32, %v273_v31 }
  0x4e   : > { %v269_v12 = vadd.f32 %v268_v11, %v267_v10  ;;  %v276_v37 = vrot.slane %v275_v34, 1 }
  0x50   : > { %283 = vrot.lane.b32.xlu1 %v269_v12, %s1160_s12  ;;  %279 = vrot.lane.b32.xlu0 %v269_v12, %s814_s14  ;;  %v277_v42 = vadd.f32 %v276_v37, %v275_v34 }
  0x54   : > { %287 = vrot.lane.b32.xlu1 %v269_v12, %s815_s29  ;;  %300 = vrot.lane.b32.xlu0 %v968_v3, %s815_s29 }
  0xac   : > { %v297_v13 = vpop.permute.xlu1 %296  ;;  %v293_v14 = vpop.permute.xlu0 %292 }
  0xad   : > { %v295_v15 = vadd.f32 %v293_v14, %v968_v3 }
  0xaf   : > { %v299_v20 = vadd.f32 %v297_v13, %v295_v15 }
  0xc2   : > { %v284_v16 = vpop.permute.xlu1 %283  ;;  %v280_v17 = vpop.permute.xlu0 %279 }
  0xc3   : > { %v282_v18 = vadd.f32 %v280_v17, %v269_v12 }
  0xc5   : > { %v286_v19 = vadd.f32 %v284_v16, %v282_v18 }
  0xc6   : > { %v288_v21 = vpop.permute.xlu1 %287  ;;  %v301_v22 = vpop.permute.xlu0 %300 }
  0xc7   : > { %v303_v23 = vadd.f32 %v301_v22, %v299_v20  ;;  %v290_v24 = vadd.f32 %v288_v21, %v286_v19 }
  0xc9   : > { %v304_v25 = vmul.f32 2.0, %v303_v23 }
  0xcb   : > { %v305_v26 = vadd.f32 %v304_v25, %v290_v24 }
  0xcd   : > { %v306_v27 = vmul.f32 0.125, %v305_v26 }
  0xcf   : > { %311 = vrot.lane.b32.xlu1 %v306_v27, %s1160_s12  ;;  %308 = vrot.lane.b32.xlu0 %v306_v27, %s815_s29  ;;  %404 = vst.msk [vmem:[%s249_s16] sm:$0x1] %vm403_vm1, %v306_v27 }
  0xd3   : > { %314 = vrot.lane.b32.xlu0 %v306_v27, %s814_s14 }
 0x141   : > { %v309_v33 = vpop.permute.xlu0 %308  ;;  %v312_v35 = vpop.permute.xlu1 %311 }
 0x142   : > { %v318_v36 = vsel %vm317_vm2, %v306_v27, %v309_v33 }
 0x143   : > { %v320_v38 = vsel %vm319_vm3, %v318_v36, %v312_v35 }
 0x145   : > { %v315_v39 = vpop.permute.xlu0 %314 }
 0x146   : > { %v322_v40 = vsel %vm321_vm4, %v320_v38, %v315_v39 }
 0x147   : > { %v323_v41 = vsub.f32 %v968_v3, %v322_v40 }
 0x149   : > { %v324_v43 = vmul.f32 2.0, %v323_v41 }
 0x14b   : > { %v325_v44 = vmul.f32 %v324_v43, %v269_v12  ;;  %v327_v46 = vmul.f32 %v324_v43, %v323_v41 }
 0x14d   : > { %v326_v45 = vadd.f32 %v325_v44, %v277_v42 }
 0x14f   : > { %v328_v47 = vadd.f32 %v327_v46, %v326_v45 }
 0x151   : > { %334 = vrot.lane.b32.xlu0 %v328_v47, %s1160_s12  ;;  %330 = vrot.lane.b32.xlu1 %v328_v47, %s814_s14 }
 0x155   : > { %338 = vrot.lane.b32.xlu1 %v328_v47, %s815_s29 }
 0x1c3   : > { %v331_v48 = vpop.permute.xlu1 %330  ;;  %v335_v50 = vpop.permute.xlu0 %334 }
 0x1c4   : > { %v333_v49 = vadd.f32 %v331_v48, %v328_v47 }
 0x1c6   : > { %v337_v51 = vadd.f32 %v335_v50, %v333_v49 }
 0x1c7   : > { %v339_v52 = vpop.permute.xlu1 %338 }
 0x1c8   : > { %v341_v53 = vadd.f32 %v339_v52, %v337_v51 }
 0x1ca   : > { %v342_v54 = vmul.f32 0.125, %v341_v53 }
 0x1cc   : > { %v343_v55 = vmax.f32 %v342_v54, 0.0 }
 0x1ce   : > { %v344_v56 = vadd.f32 1e-05, %v343_v55 }
 0x1d0   : > { %650 = vrsqrt.f32 %v344_v56  ;;  %vm347_vm5 = vcmp.eq.f32.partialorder %v344_v56, inf  ;;  %v350_v59 = vand.u32 2147483648, %v344_v56  ;;  %vm349_vm6 = vcmp.eq.f32.partialorder %v344_v56, 0.0 }
 0x1da   : > { %v651_v57 = vpop.eup %650 }
 0x1db   : > { %v346_v58 = vmul.f32 %v651_v57, %v344_v56 }
 0x1dd   : > { %v348_v60 = vsel %vm347_vm5, %v344_v56, %v346_v58 }
 0x1de   : > { %v351_v61 = vsel %vm349_vm6, %v350_v59, %v348_v60 }
 0x1df   : > { %652 = vrcp.f32 %v351_v61  ;;  %405 = vst.msk [vmem:[%s255_s28] sm:$0x1] %vm403_vm1, %v351_v61 }
 0x1e9   : > { %v653_v63 = vpop.eup %652 }
 0x1ea   : > { %v1006_v0 = vmul.f32 %v653_v63, %v352_v62 }
 0x1ec   : > { %v362_v4 = vrot.slane %v1006_v0, %v966_v2  ;;  %v356_v5 = vmul.f32 %v1006_v0, %v306_v27 }
 0x1ee   : > { %366 = vrot.lane.b32.xlu1 %v362_v4, %s1160_s12  ;;  %363 = vrot.lane.b32.xlu0 %v362_v4, %s815_s29  ;;  %v1018_v6 = vsub.f32 %v355_v1, %v356_v5  ;;  %s690_s12 = scalar_lea.vmem %s689_s25, 32 }
 0x1ef   : > { %p692_p10 = scmp.lt.s32.totalorder %s690_s12, %s684_s10 }
 0x1f0   : > { %v379_v7 = vrot.slane %v1018_v6, %v966_v2 }
 0x1f1   : > { %p693_p2 = por %p692_p10, %p691_p7 }
 0x1f3   : > { %p694_p4 = pnand %p693_p2, %p687_p13 }
 0x1f5   : > { %697 = shalt.err (!%p694_p4)
}
 0x1f6   : > { %s698_s16 = scalar_lea.hbm %s1025_s8, 16  ;;  %s702_s23 = scalar_lea.hbm %s1155_s4, 32 }
 0x1f7   : > { %p699_p5 = scmp.ne.s32.totalorder %s1025_s8, %s698_s16  ;;  %p703_p0 = scmp.lt.u32.totalorder %s1025_s8, %s1155_s4 }
 0x1f8   : > { %p704_p1 = scmp.lt.u32.totalorder %s702_s23, %s698_s16  ;;  %p706_p6 = scmp.lt.u32.totalorder %s698_s16, %s1025_s8 }
 0x1f9   : > { %p700_p8 = pnand %p699_p5, %p1168_p11 }
 0x1fa   : > { %p705_p3 = por %p704_p1, %p703_p0 }
 0x1fb   : > { %p701_p9 = pneg %p700_p8 }
 0x1fc   : > { %p707_p12 = por %p706_p6, %p705_p3 }
 0x1fe   : > { %p708_p13 = pnand %p707_p12, %p701_p9 }
 0x200   : > { %711 = shalt.err (!%p708_p13)
}
 0x201   : > { %594 = dma.vmem_to_hbm [thread:$0]  (%p1168_p11), %s442_s9, 16, %s1025_s8, %s1031_s7   ;;  %369 = vrot.lane.b32.xlu0 %v362_v4, %s814_s14  ;;  %380 = vrot.lane.b32.xlu1 %v379_v7, %s815_s29 }
 0x202   : > { %s1058_s16 = scalar_lea.hbm %s1156_s5, %s587_s13  ;;  %s454_s11 = sshll.u32 %s255_s28, 4  ;;  %s1062_s11 = int_to_ptr.vmem [resolvable:$true] %s454_s11 }
 0x203   : > { %s1169_s26 = smov 64   ;;  %s712_s8 = scalar_lea.vmem %s1062_s11, 16 }
 0x204   : > { %p713_p7 = scmp.ne.s32.totalorder %s1062_s11, %s712_s8  ;;  %s817_s29 = smov [#allocation8]  }
 0x205   : > { %383 = vrot.lane.b32.xlu0 %v379_v7, %s1169_s26  ;;  %386 = vrot.lane.b32.xlu1 %v379_v7, %s814_s14  ;;  %s716_s9 = sshll.u32 %s817_s29, 4  ;;  %s717_s9 = int_to_ptr.vmem [resolvable:$false] %s716_s9 }
 0x206   : > { %p714_p10 = pnand %p713_p7, %p1168_p11  ;;  %s718_s13 = scalar_lea.vmem %s717_s9, 32 }
 0x207   : > { %p719_p4 = scmp.lt.s32.totalorder %s1062_s11, %s717_s9  ;;  %p720_p5 = scmp.lt.s32.totalorder %s718_s13, %s712_s8 }
 0x208   : > { %p715_p2 = pneg %p714_p10 }
 0x209   : > { %p721_p8 = por %p720_p5, %p719_p4 }
 0x20b   : > { %p722_p9 = pnand %p721_p8, %p715_p2 }
 0x20d   : > { %725 = shalt.err (!%p722_p9)
}
 0x20e   : > { %s726_s14 = scalar_lea.hbm %s1058_s16, 16  ;;  %s730_s15 = scalar_lea.hbm %s1156_s5, 32 }
 0x20f   : > { %p727_p0 = scmp.ne.s32.totalorder %s1058_s16, %s726_s14  ;;  %p731_p6 = scmp.lt.u32.totalorder %s1058_s16, %s1156_s5 }
 0x210   : > { %p732_p12 = scmp.lt.u32.totalorder %s730_s15, %s726_s14  ;;  %p734_p7 = scmp.lt.u32.totalorder %s726_s14, %s1058_s16 }
 0x211   : > { %p728_p1 = pnand %p727_p0, %p1168_p11 }
 0x212   : > { %p733_p13 = por %p732_p12, %p731_p6 }
 0x213   : > { %p729_p3 = pneg %p728_p1 }
 0x214   : > { %p735_p10 = por %p734_p7, %p733_p13 }
 0x216   : > { %p736_p2 = pnand %p735_p10, %p729_p3 }
 0x218   : > { %739 = shalt.err (!%p736_p2)
}
 0x219   : > { %595 = dma.vmem_to_hbm [thread:$0]  (%p1168_p11), %s1062_s11, 16, %s1058_s16, %s1031_s7  }
 0x21a   : > { %s586_s7 = sshll.u32 %s870_s22, 5  ;;  %s1170_s10 = sshll.u32 %s956_s17, 1 }
 0x21b   : > { %s243_s16 = scalar_lea.vmem [#allocation5], %s1170_s10  ;;  %s1105_s29 = scalar_lea.hbm %s1154_s3, %s586_s7 }
 0x21c   : > { %s428_s11 = sshll.u32 %s243_s16, 4  ;;  %s407_s22 = scalar_lea.sflag [#allocation4], %s956_s17  ;;  %s1107_s11 = int_to_ptr.vmem [resolvable:$true] %s428_s11 }
 0x21d   : > { %s740_s9 = scalar_lea.vmem %s1107_s11, 32  ;;  %s818_s13 = smov [#allocation5]  }
 0x21e   : > { %p741_p4 = scmp.ne.s32.totalorder %s1107_s11, %s740_s9  ;;  %s744_s14 = sshll.u32 %s818_s13, 4  ;;  %s745_s14 = int_to_ptr.vmem [resolvable:$false] %s744_s14 }
 0x21f   : > { %s746_s28 = scalar_lea.vmem %s745_s14, 64  ;;  %p747_p9 = scmp.lt.s32.totalorder %s1107_s11, %s745_s14 }
 0x220   : > { %p742_p5 = pnand %p741_p4, %p1168_p11  ;;  %p748_p0 = scmp.lt.s32.totalorder %s746_s28, %s740_s9 }
 0x222   : > { %p743_p8 = pneg %p742_p5  ;;  %p749_p1 = por %p748_p0, %p747_p9 }
 0x224   : > { %p750_p3 = pnand %p749_p1, %p743_p8 }
 0x260   : > { %v367_v8 = vpop.permute.xlu1 %366  ;;  %v364_v9 = vpop.permute.xlu0 %363 }
 0x261   : > { %v372_v10 = vsel %vm317_vm2, %v1006_v0, %v364_v9 }
 0x262   : > { %v373_v11 = vsel %vm319_vm3, %v372_v10, %v367_v8 }
 0x273   : > { %v370_v12 = vpop.permute.xlu0 %369  ;;  %v381_v13 = vpop.permute.xlu1 %380 }
 0x274   : > { %v374_v14 = vsel %vm321_vm4, %v373_v11, %v370_v12  ;;  %v389_v16 = vsel %vm317_vm2, %v1018_v6, %v381_v13 }
 0x275   : > { %v395_v15 = vrot.slane %v374_v14, %v966_v2 }
 0x277   : > { %v384_v17 = vpop.permute.xlu0 %383  ;;  %v387_v18 = vpop.permute.xlu1 %386  ;;  %v396_v21 = vmul.f32 %v395_v15, %v968_v3 }
 0x278   : > { %v390_v19 = vsel %vm319_vm3, %v389_v16, %v384_v17 }
 0x279   : > { %v391_v20 = vsel %vm321_vm4, %v390_v19, %v387_v18 }
 0x27a   : > { %v400_v22 = vrot.slane %v391_v20, %v966_v2 }
 0x27c   : > { %v401_v23 = vadd.f32 %v400_v22, %v396_v21 }
 0x27e   : > { %402 = vst [vmem:[%s243_s16] sm:$0x3] %v401_v23 }
 0x27f   : > { %753 = shalt.err (!%p750_p3)
}
 0x280   : > { %s754_s17 = scalar_lea.hbm %s1105_s29, 32  ;;  %s758_s25 = scalar_lea.hbm %s1154_s3, 64 }
 0x281   : > { %p755_p6 = scmp.ne.s32.totalorder %s1105_s29, %s754_s17  ;;  %p759_p7 = scmp.lt.u32.totalorder %s1105_s29, %s1154_s3 }
 0x282   : > { %p760_p10 = scmp.lt.u32.totalorder %s758_s25, %s754_s17  ;;  %p762_p4 = scmp.lt.u32.totalorder %s754_s17, %s1105_s29 }
 0x283   : > { %p756_p12 = pnand %p755_p6, %p1168_p11 }
 0x284   : > { %p761_p2 = por %p760_p10, %p759_p7 }
 0x285   : > { %p757_p13 = pneg %p756_p12 }
 0x286   : > { %p763_p5 = por %p762_p4, %p761_p2 }
 0x288   : > { %p764_p8 = pnand %p763_p5, %p757_p13 }
 0x28a   : > { %767 = shalt.err (!%p764_p8)
}
 0x28b   : > { %593 = dma.vmem_to_hbm [thread:$0]  (%p1168_p11), %s1107_s11, 32, %s1105_s29, %s407_s22  }
 0x28c PF: > { %s466_s10 = sand.u32 1, %s798_s18   ;;  %p1171_p9 = scmp.ne.s32.totalorder %s1164_s6, 0 }
 0x28d   : > { %p1172_p0 = scmp.ge.s32.totalorder %s810_s21, 2  ;;  %s467_s16 = scalar_lea.sflag [#allocation4], %s466_s10 }
 0x28f   : > { %p604_p1 = pnand %p1172_p0, %p1171_p9 }
 0x291   : > { %789 = dma.done.wait (!%p604_p1), %s467_s16, 32  }
 0x292   : > { %791 = vsyncadd (!%p604_p1), %s467_s16, 4294967264  ;;  %s1173_s26 = sadd.s32 4294967294, %s810_s21  }
 0x293   : > { %s475_s8 = sand.u32 1, %s1173_s26  }
 0x294   : > { %s476_s9 = scalar_lea.sflag [#allocation7], %s475_s8 }
 0x295   : > { %793 = dma.done.wait (!%p604_p1), %s476_s9, 32  }
 0x296   : > { %795 = vsyncadd (!%p604_p1), %s476_s9, 4294967264  ;;  %p22_p11 = scmp.ge.s32.totalorder %s874_s24, 4   ;;  %s1174_s18 = smov %s802_s19 }
 0x297   : > { %s1175_s19 = smov %s806_s20  ;;  %s1176_s20 = smov %s886_s27 }
 0x298   : > { %s1177_s21 = smov %s874_s24  ;;  %24 = sbr.rel (!%p22_p11) target bundleno = 7 (0x7), region = 109 }
 0x29f   :  { %488 = vsyncpa [#allocation3], 1 }
 0x2a0   :  { %490 = vsyncpa [#allocation3 + $0x1], 1 }
 0x2a1   :  { %491 = vsyncpa [#allocation4], 1 }
 0x2a2   :  { %493 = vsyncpa [#allocation4 + $0x1], 1 }
 0x2a3   :  { %494 = vsyncpa [#allocation7], 1 }
 0x2a4   :  { %496 = vsyncpa [#allocation7 + $0x1], 1 }

</bundles_post_ra>
